<compile_context>
chip_gen: v6e
topology: v6e:2x2x1
jax: 0.10.0
libtpu: 0.0.40
codegen_flags: <defaults>
</compile_context>

<pallas_src>
import functools

import jax
import jax.numpy as jnp
import numpy as np
from jax import lax
from jax.experimental import pallas as pl
from jax.experimental.pallas import tpu as pltpu


def _round_up(x, m):
    return (x + m - 1) // m * m


def _loss_sums_kernel(x1_ref, x2_ref, y_ref, out_ref,
                      acc_b1, acc_b2, acc_i1, acc_z1, acc_i2, acc_z2, acc_yy,
                      *, pos_weight, C, R, N, R_TILE, TILE_N, grid_nh,
                      mask_rows, mask_cols):
    """Accumulates the 7 partial sums needed by Mask_DC_and_BCE_loss.

    out_ref (SMEM block, shape (1, 8), f32), written on the last grid step of this split:
      [0] sum BCE-with-logits terms for logits1 (pos_weight applied)
      [1] sum BCE-with-logits terms for logits2
      [2] sum(sigmoid(x1)[c==0] * y[c==0])   [3] sum(sigmoid(x1)[c==0]^2)
      [4] sum(sigmoid(x2)[c==0] * y[c==0])   [5] sum(sigmoid(x2)[c==0]^2)
      [6] sum(y[c==0]^2)                     [7] unused padding
    """
    p = pl.program_id(0)
    r = pl.program_id(1)
    n = pl.program_id(2)

    is_first = jnp.logical_and(r == 0, n == 0)
    is_last = jnp.logical_and(r == pl.num_programs(1) - 1,
                              n == pl.num_programs(2) - 1)

    accs = (acc_b1, acc_b2, acc_i1, acc_z1, acc_i2, acc_z2, acc_yy)

    @pl.when(is_first)
    def _():
        for acc in accs:
            acc[...] = jnp.zeros_like(acc)

    x1 = x1_ref[...].astype(jnp.float32)
    x2 = x2_ref[...].astype(jnp.float32)
    y = y_ref[...].astype(jnp.float32)
    pw = jnp.float32(pos_weight)

    # ---- masks (all static decisions are Python-level; only cheap int VPU work) ----
    row_ids = None
    if mask_rows or C > 1:
        row_ids = lax.broadcasted_iota(jnp.int32, (R_TILE, TILE_N), 0) + r * R_TILE

    valid = None                       # validity of padded rows / cols
    if mask_rows:
        valid = row_ids < R
    if mask_cols:
        col_ids = (lax.broadcasted_iota(jnp.int32, (R_TILE, TILE_N), 1)
                   + (p * grid_nh + n) * TILE_N)
        cmask = col_ids < N
        valid = cmask if valid is None else jnp.logical_and(valid, cmask)

    dmask = valid                      # dice terms: channel-0 rows only
    if C > 1:
        ch0 = (row_ids % C) == 0
        dmask = ch0 if dmask is None else jnp.logical_and(dmask, ch0)

    def masked(t, m):
        return t if m is None else jnp.where(m, t, 0.0)

    log_weight = 1.0 + (pw - 1.0) * y  # shared by both logits tensors

    def bce_and_sigmoid(x):
        # e = exp(-|x|) is shared between the stable softplus (BCE) and the sigmoid.
        e = jnp.exp(-jnp.abs(x))
        sp_negx = jnp.maximum(-x, 0.0) + jnp.log1p(e)          # softplus(-x)
        bce = (1.0 - y) * x + log_weight * sp_negx             # matches PyTorch pos_weight form
        inv = pl.reciprocal(1.0 + e, approx=False)             # EUP rcp; no second exp
        # TODO(synk): approx=True is ~free on the EUP but adds ~1e-4 relative error to the loss.
        s = jnp.where(x >= 0, inv, e * inv)                    # sigmoid(x)
        return bce, s

    bce1, s1 = bce_and_sigmoid(x1)
    bce2, s2 = bce_and_sigmoid(x2)

    # Pure elementwise accumulation in steady state (no per-step cross-lane reductions).
    acc_b1[...] += masked(bce1, valid)
    acc_b2[...] += masked(bce2, valid)
    acc_i1[...] += masked(s1 * y, dmask)
    acc_z1[...] += masked(s1 * s1, dmask)
    acc_i2[...] += masked(s2 * y, dmask)
    acc_z2[...] += masked(s2 * s2, dmask)
    acc_yy[...] += masked(y * y, dmask)

    @pl.when(is_last)
    def _():
        for q, acc in enumerate(accs):
            out_ref[0, q] = jnp.sum(acc[...])
        out_ref[0, 7] = jnp.float32(0.0)


def mask_dc_and_bce_loss(low_res_logits, low_coarse_mask_logit, target,
                         pos_weight=1.5, dice_weight=0.8, tile_elems=128 * 1024):
    """JAX/Pallas equivalent of Mask_DC_and_BCE_loss.forward."""
    # 5D handling: merge first two dims (same as .view(-1, d2, d3, d4) in PyTorch).
    if target.ndim == 5:
        target = target.reshape((-1,) + target.shape[2:])
        low_res_logits = low_res_logits.reshape((-1,) + low_res_logits.shape[2:])
        low_coarse_mask_logit = low_coarse_mask_logit.reshape(
            (-1,) + low_coarse_mask_logit.shape[2:])

    assert low_res_logits.shape == target.shape
    assert low_coarse_mask_logit.shape == target.shape
    B, C, H, W = target.shape
    R, N = B * C, H * W

    # Dense-sublane 2D view; keep native dtypes (no f32 copy materialized in HBM).
    l1 = low_res_logits.reshape(R, N)
    l2 = low_coarse_mask_logit.reshape(R, N)
    t = target.reshape(R, N)

    # ---- tile sizing ----------------------------------------------------------------
    # ~tile_elems f32 per input tile (default 512 KiB); 3 inputs x 2 buffers + 7 accumulator
    # tiles stays well under the scoped-VMEM default on v5e/v6e/v7x.
    R_TILE = min(_round_up(R, 8), 64)
    TILE_N = min(_round_up(N, 128), max(128, (tile_elems // R_TILE) // 128 * 128))
    R_pad = _round_up(R, R_TILE)
    grid_r = R_pad // R_TILE
    grid_n_total = pl.cdiv(N, TILE_N)
    NUM_SPLITS = 2 if grid_n_total >= 2 else 1       # megacore split of the lane axis (v7x)
    grid_nh = pl.cdiv(grid_n_total, NUM_SPLITS)
    N_pad = NUM_SPLITS * grid_nh * TILE_N

    if (R_pad, N_pad) != (R, N):
        pad = ((0, R_pad - R), (0, N_pad - N))
        l1 = jnp.pad(l1, pad)
        l2 = jnp.pad(l2, pad)
        t = jnp.pad(t, pad)

    kernel = functools.partial(
        _loss_sums_kernel,
        pos_weight=float(pos_weight), C=C, R=R, N=N,
        R_TILE=R_TILE, TILE_N=TILE_N, grid_nh=grid_nh,
        mask_rows=(R_pad != R), mask_cols=(N_pad != N))

    in_spec = pl.BlockSpec((R_TILE, TILE_N), lambda p, r, n: (r, p * grid_nh + n))
    out_spec = pl.BlockSpec((1, 8), lambda p, r, n: (p, 0),
                            memory_space=pltpu.MemorySpace.SMEM)

    n_el = R * N
    cost = pl.CostEstimate(
        flops=40 * n_el,
        transcendentals=6 * n_el,
        bytes_accessed=int(l1.nbytes) + int(l2.nbytes) + int(t.nbytes) + NUM_SPLITS * 8 * 4)

    sums = pl.pallas_call(
        kernel,
        out_shape=jax.ShapeDtypeStruct((NUM_SPLITS, 8), jnp.float32),
        grid_spec=pltpu.PrefetchScalarGridSpec(
            num_scalar_prefetch=0,
            grid=(NUM_SPLITS, grid_r, grid_nh),
            in_specs=[in_spec, in_spec, in_spec],
            out_specs=out_spec,
            scratch_shapes=[pltpu.VMEM((R_TILE, TILE_N), jnp.float32)] * 7),
        compiler_params=pltpu.CompilerParams(
            dimension_semantics=("parallel", "arbitrary", "arbitrary")),
        cost_estimate=cost,
    )(l1, l2, t)

    tot = jnp.sum(sums, axis=0)
    n_elems = jnp.float32(n_el)
    loss_ce1 = tot[0] / n_elems      # BCEWithLogitsLoss(low_res_logits, target), mean
    loss_ce2 = tot[1] / n_elems      # BCEWithLogitsLoss(low_coarse_mask_logit, target), mean

    smooth = jnp.float32(1e-5)
    dice1 = 1.0 - (2.0 * tot[2] + smooth) / (tot[3] + tot[6] + smooth)
    dice2 = 1.0 - (2.0 * tot[4] + smooth) / (tot[5] + tot[6] + smooth)

    dw = jnp.float32(dice_weight)
    return ((1.0 - dw) * loss_ce1 + dw * dice1
            + (0.5 - 0.5 * dw) * loss_ce2 + 0.5 * dw * dice2)


def _reference_loss(l1, l2, t, pos_weight=1.5, dice_weight=0.8):
    """Pure-JAX reference (mirrors PyTorch semantics) for correctness check."""
    def bce(x, y):
        sp_neg = jnp.maximum(-x, 0.0) + jnp.log1p(jnp.exp(-jnp.abs(x)))
        lw = 1.0 + (pos_weight - 1.0) * y
        return jnp.mean((1.0 - y) * x + lw * sp_neg)

    def dice(x, y):
        s = jax.nn.sigmoid(x)[:, 0]
        t0 = y[:, 0]
        smooth = 1e-5
        inter = jnp.sum(s * t0)
        return 1.0 - (2.0 * inter + smooth) / (jnp.sum(s * s) + jnp.sum(t0 * t0) + smooth)

    dw = dice_weight
    return ((1 - dw) * bce(l1, t) + dw * dice(l1, t)
            + (0.5 - 0.5 * dw) * bce(l2, t) + 0.5 * dw * dice(l2, t))


if __name__ == "__main__":
    POS_WEIGHT = 1.5
    DICE_WEIGHT = 0.8

    key = jax.random.PRNGKey(0)
    k1, k2, k3, k4, k5, k6 = jax.random.split(key, 6)

    # Case 1: small aligned NCHW shapes, single-tile grid.
    B, C, H, W = 2, 4, 16, 16
    low_res_logits = jax.random.normal(k1, (B, C, H, W), dtype=jnp.float32)
    low_coarse_mask_logit = jax.random.normal(k2, (B, C, H, W), dtype=jnp.float32)
    target = (jax.random.uniform(k3, (B, C, H, W)) > 0.5).astype(jnp.float32)

    loss = mask_dc_and_bce_loss(low_res_logits, low_coarse_mask_logit, target,
                                pos_weight=POS_WEIGHT, dice_weight=DICE_WEIGHT)
    loss = jax.block_until_ready(loss)
    ref = _reference_loss(low_res_logits, low_coarse_mask_logit, target,
                          pos_weight=POS_WEIGHT, dice_weight=DICE_WEIGHT)
    np.testing.assert_allclose(np.asarray(loss), np.asarray(ref), rtol=1e-4, atol=1e-4)

    # Case 2: awkward shapes + small tile hint to exercise multi-step grid, the 2-way
    # "parallel" lane split, and row/col padding masks.
    B2, C2, H2, W2 = 2, 3, 13, 21
    l1b = jax.random.normal(k4, (B2, C2, H2, W2), dtype=jnp.float32)
    l2b = jax.random.normal(k5, (B2, C2, H2, W2), dtype=jnp.float32)
    tb = (jax.random.uniform(k6, (B2, C2, H2, W2)) > 0.5).astype(jnp.float32)

    loss2 = mask_dc_and_bce_loss(l1b, l2b, tb, pos_weight=POS_WEIGHT,
                                 dice_weight=DICE_WEIGHT, tile_elems=1024)
    loss2 = jax.block_until_ready(loss2)
    ref2 = _reference_loss(l1b, l2b, tb, pos_weight=POS_WEIGHT, dice_weight=DICE_WEIGHT)
    np.testing.assert_allclose(np.asarray(loss2), np.asarray(ref2), rtol=1e-4, atol=1e-4)

    print("KERNEL_OK")
</pallas_src>

<mosaic_0001>
module attributes {stable_mosaic.version = 11 : i64} {
  func.func @_loss_sums_kernel(%arg0: i32, %arg1: i32, %arg2: i32, %arg3: memref<8x256xf32, #tpu.memory_space<vmem>>, %arg4: memref<8x256xf32, #tpu.memory_space<vmem>>, %arg5: memref<8x256xf32, #tpu.memory_space<vmem>>, %arg6: memref<1x8xf32, #tpu.memory_space<smem>>, %arg7: memref<8x256xf32, #tpu.memory_space<vmem>>, %arg8: memref<8x256xf32, #tpu.memory_space<vmem>>, %arg9: memref<8x256xf32, #tpu.memory_space<vmem>>, %arg10: memref<8x256xf32, #tpu.memory_space<vmem>>, %arg11: memref<8x256xf32, #tpu.memory_space<vmem>>, %arg12: memref<8x256xf32, #tpu.memory_space<vmem>>, %arg13: memref<8x256xf32, #tpu.memory_space<vmem>>) attributes {dimension_semantics = [#tpu.dimension_semantics<parallel>, #tpu.dimension_semantics<arbitrary>, #tpu.dimension_semantics<arbitrary>], iteration_bounds = array<i64: 1, 1, 1>, scalar_prefetch = 0 : i64, scratch_operands = 7 : i64, tpu.core_type = #tpu.core_type<tc>, window_params = [{transform_indices = @transform_0, window_bounds = array<i64: 8, 256>}, {transform_indices = @transform_1, window_bounds = array<i64: 8, 256>}, {transform_indices = @transform_2, window_bounds = array<i64: 8, 256>}, {transform_indices = @transform_3, window_bounds = array<i64: 1, 8>}]} {
    %c0_i32 = arith.constant 0 : i32
    %0 = arith.cmpi eq, %arg1, %c0_i32 : i32
    %c0_i32_0 = arith.constant 0 : i32
    %1 = arith.cmpi eq, %arg2, %c0_i32_0 : i32
    %2 = arith.andi %0, %1 : i1
    %c0_i32_1 = arith.constant 0 : i32
    %3 = arith.cmpi eq, %arg1, %c0_i32_1 : i32
    %c0_i32_2 = arith.constant 0 : i32
    %4 = arith.cmpi eq, %arg2, %c0_i32_2 : i32
    %5 = arith.andi %3, %4 : i1
    %6 = arith.extui %2 : i1 to i32
    %c0_i32_3 = arith.constant 0 : i32
    %7 = arith.cmpi ne, %6, %c0_i32_3 : i32
    scf.if %7 {
      %cst_62 = arith.constant 0.000000e+00 : f32
      %120 = vector.broadcast %cst_62 : f32 to vector<8x256xf32>
      %c0_63 = arith.constant 0 : index
      %c0_64 = arith.constant 0 : index
      %121 = vector.load %arg7[%c0_63, %c0_64] : memref<8x256xf32, #tpu.memory_space<vmem>>, vector<8x256xf32>
      tpu.vector_store %arg7[%c0_63, %c0_64], %120 {strides = array<i32>} : memref<8x256xf32, #tpu.memory_space<vmem>>, vector<8x256xf32>,
      %cst_65 = arith.constant 0.000000e+00 : f32
      %122 = vector.broadcast %cst_65 : f32 to vector<8x256xf32>
      %c0_66 = arith.constant 0 : index
      %c0_67 = arith.constant 0 : index
      %123 = vector.load %arg8[%c0_66, %c0_67] : memref<8x256xf32, #tpu.memory_space<vmem>>, vector<8x256xf32>
      tpu.vector_store %arg8[%c0_66, %c0_67], %122 {strides = array<i32>} : memref<8x256xf32, #tpu.memory_space<vmem>>, vector<8x256xf32>,
      %cst_68 = arith.constant 0.000000e+00 : f32
      %124 = vector.broadcast %cst_68 : f32 to vector<8x256xf32>
      %c0_69 = arith.constant 0 : index
      %c0_70 = arith.constant 0 : index
      %125 = vector.load %arg9[%c0_69, %c0_70] : memref<8x256xf32, #tpu.memory_space<vmem>>, vector<8x256xf32>
      tpu.vector_store %arg9[%c0_69, %c0_70], %124 {strides = array<i32>} : memref<8x256xf32, #tpu.memory_space<vmem>>, vector<8x256xf32>,
      %cst_71 = arith.constant 0.000000e+00 : f32
      %126 = vector.broadcast %cst_71 : f32 to vector<8x256xf32>
      %c0_72 = arith.constant 0 : index
      %c0_73 = arith.constant 0 : index
      %127 = vector.load %arg10[%c0_72, %c0_73] : memref<8x256xf32, #tpu.memory_space<vmem>>, vector<8x256xf32>
      tpu.vector_store %arg10[%c0_72, %c0_73], %126 {strides = array<i32>} : memref<8x256xf32, #tpu.memory_space<vmem>>, vector<8x256xf32>,
      %cst_74 = arith.constant 0.000000e+00 : f32
      %128 = vector.broadcast %cst_74 : f32 to vector<8x256xf32>
      %c0_75 = arith.constant 0 : index
      %c0_76 = arith.constant 0 : index
      %129 = vector.load %arg11[%c0_75, %c0_76] : memref<8x256xf32, #tpu.memory_space<vmem>>, vector<8x256xf32>
      tpu.vector_store %arg11[%c0_75, %c0_76], %128 {strides = array<i32>} : memref<8x256xf32, #tpu.memory_space<vmem>>, vector<8x256xf32>,
      %cst_77 = arith.constant 0.000000e+00 : f32
      %130 = vector.broadcast %cst_77 : f32 to vector<8x256xf32>
      %c0_78 = arith.constant 0 : index
      %c0_79 = arith.constant 0 : index
      %131 = vector.load %arg12[%c0_78, %c0_79] : memref<8x256xf32, #tpu.memory_space<vmem>>, vector<8x256xf32>
      tpu.vector_store %arg12[%c0_78, %c0_79], %130 {strides = array<i32>} : memref<8x256xf32, #tpu.memory_space<vmem>>, vector<8x256xf32>,
      %cst_80 = arith.constant 0.000000e+00 : f32
      %132 = vector.broadcast %cst_80 : f32 to vector<8x256xf32>
      %c0_81 = arith.constant 0 : index
      %c0_82 = arith.constant 0 : index
      %133 = vector.load %arg13[%c0_81, %c0_82] : memref<8x256xf32, #tpu.memory_space<vmem>>, vector<8x256xf32>
      tpu.vector_store %arg13[%c0_81, %c0_82], %132 {strides = array<i32>} : memref<8x256xf32, #tpu.memory_space<vmem>>, vector<8x256xf32>,
    } else {
    }
    %c0 = arith.constant 0 : index
    %c0_4 = arith.constant 0 : index
    %8 = vector.load %arg3[%c0, %c0_4] : memref<8x256xf32, #tpu.memory_space<vmem>>, vector<8x256xf32>
    %c0_5 = arith.constant 0 : index
    %c0_6 = arith.constant 0 : index
    %9 = vector.load %arg4[%c0_5, %c0_6] : memref<8x256xf32, #tpu.memory_space<vmem>>, vector<8x256xf32>
    %c0_7 = arith.constant 0 : index
    %c0_8 = arith.constant 0 : index
    %10 = vector.load %arg5[%c0_7, %c0_8] : memref<8x256xf32, #tpu.memory_space<vmem>>, vector<8x256xf32>
    %11 = tpu.iota {dimensions = array<i32: 0>} : vector<8x256xi32>
    %c8_i32 = arith.constant 8 : i32
    %12 = arith.muli %arg1, %c8_i32 : i32
    %13 = vector.broadcast %12 : i32 to vector<8x256xi32>
    %14 = arith.addi %11, %13 : vector<8x256xi32>
    %c4_i32 = arith.constant 4 : i32
    %c0_i32_9 = arith.constant 0 : i32
    %15 = arith.cmpi eq, %c4_i32, %c0_i32_9 : i32
    %c1_i32 = arith.constant 1 : i32
    %16 = arith.select %15, %c1_i32, %c4_i32 : i32
    %17 = vector.broadcast %16 : i32 to vector<8x256xi32>
    %18 = arith.remsi %14, %17 : vector<8x256xi32>
    %c0_i32_10 = arith.constant 0 : i32
    %19 = vector.broadcast %c0_i32_10 : i32 to vector<8x256xi32>
    %20 = arith.cmpi ne, %18, %19 : vector<8x256xi32>
    %c0_i32_11 = arith.constant 0 : i32
    %21 = vector.broadcast %c0_i32_11 : i32 to vector<8x256xi32>
    %22 = arith.cmpi slt, %18, %21 : vector<8x256xi32>
    %c0_i32_12 = arith.constant 0 : i32
    %23 = arith.cmpi slt, %16, %c0_i32_12 : i32
    %24 = vector.broadcast %23 : i1 to vector<8x256xi1>
    %25 = vector.broadcast %24 : vector<8x256xi1> to vector<8x256xi1>
    %26 = arith.xori %22, %25 : vector<8x256xi1>
    %27 = arith.andi %26, %20 : vector<8x256xi1>
    %28 = vector.broadcast %16 : i32 to vector<8x256xi32>
    %29 = arith.addi %18, %28 : vector<8x256xi32>
    %30 = arith.select %27, %29, %18 : vector<8x256xi1>, vector<8x256xi32>
    %c0_i32_13 = arith.constant 0 : i32
    %31 = vector.broadcast %c0_i32_13 : i32 to vector<8x256xi32>
    %32 = arith.cmpi eq, %30, %31 : vector<8x256xi32>
    %cst = arith.constant 1.500000e+00 : f32
    %cst_14 = arith.constant 1.000000e+00 : f32
    %33 = arith.subf %cst, %cst_14 : f32
    %34 = vector.broadcast %33 : f32 to vector<8x256xf32>
    %35 = arith.mulf %34, %10 : vector<8x256xf32>
    %cst_15 = arith.constant 1.000000e+00 : f32
    %36 = vector.broadcast %cst_15 : f32 to vector<8x256xf32>
    %37 = arith.addf %36, %35 : vector<8x256xf32>
    %38 = math.absf %8 : vector<8x256xf32>
    %cst_16 = arith.constant 0.000000e+00 : f32
    %39 = vector.broadcast %cst_16 : f32 to vector<8x256xf32>
    %40 = arith.subf %39, %38 : vector<8x256xf32>
    %41 = math.exp %40 : vector<8x256xf32>
    %cst_17 = arith.constant 0.000000e+00 : f32
    %42 = vector.broadcast %cst_17 : f32 to vector<8x256xf32>
    %43 = arith.subf %42, %8 : vector<8x256xf32>
    %cst_18 = arith.constant 0.000000e+00 : f32
    %44 = vector.broadcast %cst_18 : f32 to vector<8x256xf32>
    %45 = arith.maximumf %43, %44 : vector<8x256xf32>
    %46 = math.log1p %41 : vector<8x256xf32>
    %47 = arith.addf %45, %46 : vector<8x256xf32>
    %cst_19 = arith.constant 1.000000e+00 : f32
    %48 = vector.broadcast %cst_19 : f32 to vector<8x256xf32>
    %49 = arith.subf %48, %10 : vector<8x256xf32>
    %50 = arith.mulf %49, %8 : vector<8x256xf32>
    %51 = arith.mulf %37, %47 : vector<8x256xf32>
    %52 = arith.addf %50, %51 : vector<8x256xf32>
    %cst_20 = arith.constant 1.000000e+00 : f32
    %53 = vector.broadcast %cst_20 : f32 to vector<8x256xf32>
    %54 = arith.addf %53, %41 : vector<8x256xf32>
    %55 = tpu.reciprocal %54 : vector<8x256xf32> -> vector<8x256xf32>
    %cst_21 = arith.constant 0.000000e+00 : f32
    %56 = vector.broadcast %cst_21 : f32 to vector<8x256xf32>
    %57 = arith.cmpf oge, %8, %56 : vector<8x256xf32>
    %58 = arith.mulf %41, %55 : vector<8x256xf32>
    %59 = arith.select %57, %55, %58 : vector<8x256xi1>, vector<8x256xf32>
    %60 = math.absf %9 : vector<8x256xf32>
    %cst_22 = arith.constant 0.000000e+00 : f32
    %61 = vector.broadcast %cst_22 : f32 to vector<8x256xf32>
    %62 = arith.subf %61, %60 : vector<8x256xf32>
    %63 = math.exp %62 : vector<8x256xf32>
    %cst_23 = arith.constant 0.000000e+00 : f32
    %64 = vector.broadcast %cst_23 : f32 to vector<8x256xf32>
    %65 = arith.subf %64, %9 : vector<8x256xf32>
    %cst_24 = arith.constant 0.000000e+00 : f32
    %66 = vector.broadcast %cst_24 : f32 to vector<8x256xf32>
    %67 = arith.maximumf %65, %66 : vector<8x256xf32>
    %68 = math.log1p %63 : vector<8x256xf32>
    %69 = arith.addf %67, %68 : vector<8x256xf32>
    %cst_25 = arith.constant 1.000000e+00 : f32
    %70 = vector.broadcast %cst_25 : f32 to vector<8x256xf32>
    %71 = arith.subf %70, %10 : vector<8x256xf32>
    %72 = arith.mulf %71, %9 : vector<8x256xf32>
    %73 = arith.mulf %37, %69 : vector<8x256xf32>
    %74 = arith.addf %72, %73 : vector<8x256xf32>
    %cst_26 = arith.constant 1.000000e+00 : f32
    %75 = vector.broadcast %cst_26 : f32 to vector<8x256xf32>
    %76 = arith.addf %75, %63 : vector<8x256xf32>
    %77 = tpu.reciprocal %76 : vector<8x256xf32> -> vector<8x256xf32>
    %cst_27 = arith.constant 0.000000e+00 : f32
    %78 = vector.broadcast %cst_27 : f32 to vector<8x256xf32>
    %79 = arith.cmpf oge, %9, %78 : vector<8x256xf32>
    %80 = arith.mulf %63, %77 : vector<8x256xf32>
    %81 = arith.select %79, %77, %80 : vector<8x256xi1>, vector<8x256xf32>
    %c0_28 = arith.constant 0 : index
    %c0_29 = arith.constant 0 : index
    %82 = vector.load %arg7[%c0_28, %c0_29] : memref<8x256xf32, #tpu.memory_space<vmem>>, vector<8x256xf32>
    %83 = arith.addf %82, %52 : vector<8x256xf32>
    %c0_30 = arith.constant 0 : index
    %c0_31 = arith.constant 0 : index
    %84 = vector.load %arg7[%c0_30, %c0_31] : memref<8x256xf32, #tpu.memory_space<vmem>>, vector<8x256xf32>
    tpu.vector_store %arg7[%c0_30, %c0_31], %83 {strides = array<i32>} : memref<8x256xf32, #tpu.memory_space<vmem>>, vector<8x256xf32>,
    %c0_32 = arith.constant 0 : index
    %c0_33 = arith.constant 0 : index
    %85 = vector.load %arg8[%c0_32, %c0_33] : memref<8x256xf32, #tpu.memory_space<vmem>>, vector<8x256xf32>
    %86 = arith.addf %85, %74 : vector<8x256xf32>
    %c0_34 = arith.constant 0 : index
    %c0_35 = arith.constant 0 : index
    %87 = vector.load %arg8[%c0_34, %c0_35] : memref<8x256xf32, #tpu.memory_space<vmem>>, vector<8x256xf32>
    tpu.vector_store %arg8[%c0_34, %c0_35], %86 {strides = array<i32>} : memref<8x256xf32, #tpu.memory_space<vmem>>, vector<8x256xf32>,
    %c0_36 = arith.constant 0 : index
    %c0_37 = arith.constant 0 : index
    %88 = vector.load %arg9[%c0_36, %c0_37] : memref<8x256xf32, #tpu.memory_space<vmem>>, vector<8x256xf32>
    %89 = arith.mulf %59, %10 : vector<8x256xf32>
    %cst_38 = arith.constant 0.000000e+00 : f32
    %90 = vector.broadcast %cst_38 : f32 to vector<8x256xf32>
    %91 = arith.select %32, %89, %90 : vector<8x256xi1>, vector<8x256xf32>
    %92 = arith.addf %88, %91 : vector<8x256xf32>
    %c0_39 = arith.constant 0 : index
    %c0_40 = arith.constant 0 : index
    %93 = vector.load %arg9[%c0_39, %c0_40] : memref<8x256xf32, #tpu.memory_space<vmem>>, vector<8x256xf32>
    tpu.vector_store %arg9[%c0_39, %c0_40], %92 {strides = array<i32>} : memref<8x256xf32, #tpu.memory_space<vmem>>, vector<8x256xf32>,
    %c0_41 = arith.constant 0 : index
    %c0_42 = arith.constant 0 : index
    %94 = vector.load %arg10[%c0_41, %c0_42] : memref<8x256xf32, #tpu.memory_space<vmem>>, vector<8x256xf32>
    %95 = arith.mulf %59, %59 : vector<8x256xf32>
    %cst_43 = arith.constant 0.000000e+00 : f32
    %96 = vector.broadcast %cst_43 : f32 to vector<8x256xf32>
    %97 = arith.select %32, %95, %96 : vector<8x256xi1>, vector<8x256xf32>
    %98 = arith.addf %94, %97 : vector<8x256xf32>
    %c0_44 = arith.constant 0 : index
    %c0_45 = arith.constant 0 : index
    %99 = vector.load %arg10[%c0_44, %c0_45] : memref<8x256xf32, #tpu.memory_space<vmem>>, vector<8x256xf32>
    tpu.vector_store %arg10[%c0_44, %c0_45], %98 {strides = array<i32>} : memref<8x256xf32, #tpu.memory_space<vmem>>, vector<8x256xf32>,
    %c0_46 = arith.constant 0 : index
    %c0_47 = arith.constant 0 : index
    %100 = vector.load %arg11[%c0_46, %c0_47] : memref<8x256xf32, #tpu.memory_space<vmem>>, vector<8x256xf32>
    %101 = arith.mulf %81, %10 : vector<8x256xf32>
    %cst_48 = arith.constant 0.000000e+00 : f32
    %102 = vector.broadcast %cst_48 : f32 to vector<8x256xf32>
    %103 = arith.select %32, %101, %102 : vector<8x256xi1>, vector<8x256xf32>
    %104 = arith.addf %100, %103 : vector<8x256xf32>
    %c0_49 = arith.constant 0 : index
    %c0_50 = arith.constant 0 : index
    %105 = vector.load %arg11[%c0_49, %c0_50] : memref<8x256xf32, #tpu.memory_space<vmem>>, vector<8x256xf32>
    tpu.vector_store %arg11[%c0_49, %c0_50], %104 {strides = array<i32>} : memref<8x256xf32, #tpu.memory_space<vmem>>, vector<8x256xf32>,
    %c0_51 = arith.constant 0 : index
    %c0_52 = arith.constant 0 : index
    %106 = vector.load %arg12[%c0_51, %c0_52] : memref<8x256xf32, #tpu.memory_space<vmem>>, vector<8x256xf32>
    %107 = arith.mulf %81, %81 : vector<8x256xf32>
    %cst_53 = arith.constant 0.000000e+00 : f32
    %108 = vector.broadcast %cst_53 : f32 to vector<8x256xf32>
    %109 = arith.select %32, %107, %108 : vector<8x256xi1>, vector<8x256xf32>
    %110 = arith.addf %106, %109 : vector<8x256xf32>
    %c0_54 = arith.constant 0 : index
    %c0_55 = arith.constant 0 : index
    %111 = vector.load %arg12[%c0_54, %c0_55] : memref<8x256xf32, #tpu.memory_space<vmem>>, vector<8x256xf32>
    tpu.vector_store %arg12[%c0_54, %c0_55], %110 {strides = array<i32>} : memref<8x256xf32, #tpu.memory_space<vmem>>, vector<8x256xf32>,
    %c0_56 = arith.constant 0 : index
    %c0_57 = arith.constant 0 : index
    %112 = vector.load %arg13[%c0_56, %c0_57] : memref<8x256xf32, #tpu.memory_space<vmem>>, vector<8x256xf32>
    %113 = arith.mulf %10, %10 : vector<8x256xf32>
    %cst_58 = arith.constant 0.000000e+00 : f32
    %114 = vector.broadcast %cst_58 : f32 to vector<8x256xf32>
    %115 = arith.select %32, %113, %114 : vector<8x256xi1>, vector<8x256xf32>
    %116 = arith.addf %112, %115 : vector<8x256xf32>
    %c0_59 = arith.constant 0 : index
    %c0_60 = arith.constant 0 : index
    %117 = vector.load %arg13[%c0_59, %c0_60] : memref<8x256xf32, #tpu.memory_space<vmem>>, vector<8x256xf32>
    tpu.vector_store %arg13[%c0_59, %c0_60], %116 {strides = array<i32>} : memref<8x256xf32, #tpu.memory_space<vmem>>, vector<8x256xf32>,
    %118 = arith.extui %5 : i1 to i32
    %c0_i32_61 = arith.constant 0 : i32
    %119 = arith.cmpi ne, %118, %c0_i32_61 : i32
    scf.if %119 {
      %c0_62 = arith.constant 0 : index
      %c0_63 = arith.constant 0 : index
      %120 = vector.load %arg7[%c0_62, %c0_63] : memref<8x256xf32, #tpu.memory_space<vmem>>, vector<8x256xf32>
      %121 = vector.shape_cast %120 : vector<8x256xf32> to vector<1x8x256xf32>
      %cst_64 = arith.constant dense<0.000000e+00> : vector<1xf32>
      %122 = vector.multi_reduction <add>, %121, %cst_64 [1, 2] : vector<1x8x256xf32> to vector<1xf32>
      %123 = vector.shape_cast %122 : vector<1xf32> to vector<1x1x1xf32>
      %124 = vector.extract %123[0, 0, 0] : f32 from vector<1x1x1xf32>
      %c0_65 = arith.constant 0 : index
      %c0_66 = arith.constant 0 : index
      %125 = memref.load %arg6[%c0_65, %c0_66] : memref<1x8xf32, #tpu.memory_space<smem>>
      memref.store %124, %arg6[%c0_65, %c0_66] : memref<1x8xf32, #tpu.memory_space<smem>>
      %c0_67 = arith.constant 0 : index
      %c0_68 = arith.constant 0 : index
      %126 = vector.load %arg8[%c0_67, %c0_68] : memref<8x256xf32, #tpu.memory_space<vmem>>, vector<8x256xf32>
      %127 = vector.shape_cast %126 : vector<8x256xf32> to vector<1x8x256xf32>
      %cst_69 = arith.constant dense<0.000000e+00> : vector<1xf32>
      %128 = vector.multi_reduction <add>, %127, %cst_69 [1, 2] : vector<1x8x256xf32> to vector<1xf32>
      %129 = vector.shape_cast %128 : vector<1xf32> to vector<1x1x1xf32>
      %130 = vector.extract %129[0, 0, 0] : f32 from vector<1x1x1xf32>
      %c0_70 = arith.constant 0 : index
      %c1 = arith.constant 1 : index
      %131 = memref.load %arg6[%c0_70, %c1] : memref<1x8xf32, #tpu.memory_space<smem>>
      memref.store %130, %arg6[%c0_70, %c1] : memref<1x8xf32, #tpu.memory_space<smem>>
      %c0_71 = arith.constant 0 : index
      %c0_72 = arith.constant 0 : index
      %132 = vector.load %arg9[%c0_71, %c0_72] : memref<8x256xf32, #tpu.memory_space<vmem>>, vector<8x256xf32>
      %133 = vector.shape_cast %132 : vector<8x256xf32> to vector<1x8x256xf32>
      %cst_73 = arith.constant dense<0.000000e+00> : vector<1xf32>
      %134 = vector.multi_reduction <add>, %133, %cst_73 [1, 2] : vector<1x8x256xf32> to vector<1xf32>
      %135 = vector.shape_cast %134 : vector<1xf32> to vector<1x1x1xf32>
      %136 = vector.extract %135[0, 0, 0] : f32 from vector<1x1x1xf32>
      %c0_74 = arith.constant 0 : index
      %c2 = arith.constant 2 : index
      %137 = memref.load %arg6[%c0_74, %c2] : memref<1x8xf32, #tpu.memory_space<smem>>
      memref.store %136, %arg6[%c0_74, %c2] : memref<1x8xf32, #tpu.memory_space<smem>>
      %c0_75 = arith.constant 0 : index
      %c0_76 = arith.constant 0 : index
      %138 = vector.load %arg10[%c0_75, %c0_76] : memref<8x256xf32, #tpu.memory_space<vmem>>, vector<8x256xf32>
      %139 = vector.shape_cast %138 : vector<8x256xf32> to vector<1x8x256xf32>
      %cst_77 = arith.constant dense<0.000000e+00> : vector<1xf32>
      %140 = vector.multi_reduction <add>, %139, %cst_77 [1, 2] : vector<1x8x256xf32> to vector<1xf32>
      %141 = vector.shape_cast %140 : vector<1xf32> to vector<1x1x1xf32>
      %142 = vector.extract %141[0, 0, 0] : f32 from vector<1x1x1xf32>
      %c0_78 = arith.constant 0 : index
      %c3 = arith.constant 3 : index
      %143 = memref.load %arg6[%c0_78, %c3] : memref<1x8xf32, #tpu.memory_space<smem>>
      memref.store %142, %arg6[%c0_78, %c3] : memref<1x8xf32, #tpu.memory_space<smem>>
      %c0_79 = arith.constant 0 : index
      %c0_80 = arith.constant 0 : index
      %144 = vector.load %arg11[%c0_79, %c0_80] : memref<8x256xf32, #tpu.memory_space<vmem>>, vector<8x256xf32>
      %145 = vector.shape_cast %144 : vector<8x256xf32> to vector<1x8x256xf32>
      %cst_81 = arith.constant dense<0.000000e+00> : vector<1xf32>
      %146 = vector.multi_reduction <add>, %145, %cst_81 [1, 2] : vector<1x8x256xf32> to vector<1xf32>
      %147 = vector.shape_cast %146 : vector<1xf32> to vector<1x1x1xf32>
      %148 = vector.extract %147[0, 0, 0] : f32 from vector<1x1x1xf32>
      %c0_82 = arith.constant 0 : index
      %c4 = arith.constant 4 : index
      %149 = memref.load %arg6[%c0_82, %c4] : memref<1x8xf32, #tpu.memory_space<smem>>
      memref.store %148, %arg6[%c0_82, %c4] : memref<1x8xf32, #tpu.memory_space<smem>>
      %c0_83 = arith.constant 0 : index
      %c0_84 = arith.constant 0 : index
      %150 = vector.load %arg12[%c0_83, %c0_84] : memref<8x256xf32, #tpu.memory_space<vmem>>, vector<8x256xf32>
      %151 = vector.shape_cast %150 : vector<8x256xf32> to vector<1x8x256xf32>
      %cst_85 = arith.constant dense<0.000000e+00> : vector<1xf32>
      %152 = vector.multi_reduction <add>, %151, %cst_85 [1, 2] : vector<1x8x256xf32> to vector<1xf32>
      %153 = vector.shape_cast %152 : vector<1xf32> to vector<1x1x1xf32>
      %154 = vector.extract %153[0, 0, 0] : f32 from vector<1x1x1xf32>
      %c0_86 = arith.constant 0 : index
      %c5 = arith.constant 5 : index
      %155 = memref.load %arg6[%c0_86, %c5] : memref<1x8xf32, #tpu.memory_space<smem>>
      memref.store %154, %arg6[%c0_86, %c5] : memref<1x8xf32, #tpu.memory_space<smem>>
      %c0_87 = arith.constant 0 : index
      %c0_88 = arith.constant 0 : index
      %156 = vector.load %arg13[%c0_87, %c0_88] : memref<8x256xf32, #tpu.memory_space<vmem>>, vector<8x256xf32>
      %157 = vector.shape_cast %156 : vector<8x256xf32> to vector<1x8x256xf32>
      %cst_89 = arith.constant dense<0.000000e+00> : vector<1xf32>
      %158 = vector.multi_reduction <add>, %157, %cst_89 [1, 2] : vector<1x8x256xf32> to vector<1xf32>
      %159 = vector.shape_cast %158 : vector<1xf32> to vector<1x1x1xf32>
      %160 = vector.extract %159[0, 0, 0] : f32 from vector<1x1x1xf32>
      %c0_90 = arith.constant 0 : index
      %c6 = arith.constant 6 : index
      %161 = memref.load %arg6[%c0_90, %c6] : memref<1x8xf32, #tpu.memory_space<smem>>
      memref.store %160, %arg6[%c0_90, %c6] : memref<1x8xf32, #tpu.memory_space<smem>>
      %cst_91 = arith.constant 0.000000e+00 : f32
      %c0_92 = arith.constant 0 : index
      %c7 = arith.constant 7 : index
      %162 = memref.load %arg6[%c0_92, %c7] : memref<1x8xf32, #tpu.memory_space<smem>>
      memref.store %cst_91, %arg6[%c0_92, %c7] : memref<1x8xf32, #tpu.memory_space<smem>>
    } else {
    }
    return
  }
  func.func @transform_0(%arg0: i32, %arg1: i32, %arg2: i32) -> (i32, i32) {
    %c1_i32 = arith.constant 1 : i32
    %0 = arith.muli %arg0, %c1_i32 : i32
    %1 = arith.addi %0, %arg2 : i32
    %c0_i32 = arith.constant 0 : i32
    return %arg1, %1 : i32, i32
  }
  func.func @transform_1(%arg0: i32, %arg1: i32, %arg2: i32) -> (i32, i32) {
    %c1_i32 = arith.constant 1 : i32
    %0 = arith.muli %arg0, %c1_i32 : i32
    %1 = arith.addi %0, %arg2 : i32
    %c0_i32 = arith.constant 0 : i32
    return %arg1, %1 : i32, i32
  }
  func.func @transform_2(%arg0: i32, %arg1: i32, %arg2: i32) -> (i32, i32) {
    %c1_i32 = arith.constant 1 : i32
    %0 = arith.muli %arg0, %c1_i32 : i32
    %1 = arith.addi %0, %arg2 : i32
    %c0_i32 = arith.constant 0 : i32
    return %arg1, %1 : i32, i32
  }
  func.func @transform_3(%arg0: i32, %arg1: i32, %arg2: i32) -> (i32, i32) {
    %c0_i32 = arith.constant 0 : i32
    %c0_i32_0 = arith.constant 0 : i32
    return %arg0, %c0_i32 : i32, i32
  }
}

</mosaic_0001>

<bundles_post_ra>
// kernel: tpu_custom_call.1
= control target key start
LH: loop header
LB: loop body
LE: loop exit
PB: predicated region body
PF: predicated region fallthrough
CT: control target
= control target key end

     0   :  { %8 = vsyncpa [#allocation10], 0  ;;  %s677_s0 = inlined_call_operand.hbm [shape: f32[8,256], index: 0, kind: input, shape index: {}]   ;;  %s678_s1 = inlined_call_operand.hbm [shape: f32[8,256], index: 1, kind: input, shape index: {}]   ;;  %s679_s2 = inlined_call_operand.hbm [shape: f32[8,256], index: 2, kind: input, shape index: {}]   ;;  %s680_s3 = inlined_call_operand.hbm [shape: f32[1,8], index: 3, kind: output, shape index: {}]  }
   0x1   :  { %9 = vsyncpa [#allocation13], 0 }
   0x2   :  { %10 = vsyncpa [#allocation11], 0  ;;  %s510_s12 = smov [#allocation12]   ;;  %s511_s14 = smov [#allocation9]  }
   0x3   :  { %s35_s13 = sshll.u32 %s510_s12, 4  ;;  %s21_s15 = sshll.u32 %s511_s14, 4  ;;  %s36_s13 = int_to_ptr.vmem [resolvable:$true] %s35_s13  ;;  %s22_s15 = int_to_ptr.vmem [resolvable:$true] %s21_s15 }
   0x4   :  { %s444_s16 = scalar_lea.vmem %s36_s13, 256  ;;  %p449_p1 = scmp.lt.s32.totalorder %s36_s13, %s36_s13 }
   0x5   :  { %p445_p0 = scmp.ne.s32.totalorder %s36_s13, %s444_s16  ;;  %p450_p2 = scmp.lt.s32.totalorder %s444_s16, %s444_s16 }
   0x7   :  { %p451_p3 = por %p450_p2, %p449_p1 }
   0x9   :  { %p452_p4 = pnand %p451_p3, %p445_p0 }
   0xb   :  { %455 = shalt.err (!%p452_p4)
}
   0xc   :  { %38 = dma.hbm_to_vmem [thread:$0]  %s678_s1, 256, %s36_s13, [#allocation13]  }
   0xd   :  { %s464_s19 = scalar_lea.vmem %s22_s15, 256  ;;  %p469_p6 = scmp.lt.s32.totalorder %s22_s15, %s22_s15 }
   0xe   :  { %p465_p5 = scmp.ne.s32.totalorder %s22_s15, %s464_s19  ;;  %p470_p7 = scmp.lt.s32.totalorder %s464_s19, %s464_s19 }
  0x10   :  { %p471_p8 = por %p470_p7, %p469_p6 }
  0x12   :  { %p472_p9 = pnand %p471_p8, %p465_p5 }
  0x14   :  { %475 = shalt.err (!%p472_p9)
}
  0x15   :  { %24 = dma.hbm_to_vmem [thread:$0]  %s677_s0, 256, %s22_s15, [#allocation10]  }
  0x16   :  { %s512_s22 = smov [#allocation14]  }
  0x17   :  { %s49_s23 = sshll.u32 %s512_s22, 4  ;;  %s50_s23 = int_to_ptr.vmem [resolvable:$true] %s49_s23 }
  0x18   :  { %s484_s24 = scalar_lea.vmem %s50_s23, 256  ;;  %p489_p11 = scmp.lt.s32.totalorder %s50_s23, %s50_s23 }
  0x19   :  { %p485_p10 = scmp.ne.s32.totalorder %s50_s23, %s484_s24  ;;  %p490_p12 = scmp.lt.s32.totalorder %s484_s24, %s484_s24 }
  0x1b   :  { %p491_p13 = por %p490_p12, %p489_p11 }
  0x1d   :  { %p492_p0 = pnand %p491_p13, %p485_p10 }
  0x1f   :  { %495 = shalt.err (!%p492_p0)
}
  0x20   :  { %52 = dma.hbm_to_vmem [thread:$0]  %s679_s2, 256, %s50_s23, [#allocation13]  }
  0x21   :  { %504 = dma.done.wait [#allocation10], 256  }
  0x22   :  { %505 = vsyncadd [#allocation10], 4294967040 }
  0x23   :  { %506 = dma.done.wait [#allocation13], 512  }
  0x24   :  { %507 = vsyncadd [#allocation13], 4294966784  ;;  %v544_v0 = vld [vmem:[#allocation12] sm:$0xff]  ;;  %v546_v1 = vld [vmem:[#allocation12 + $0x8] sm:$0xff]  ;;  %v94_v16 = vlaneseq  ;;  %s513_s0 = smov 0.0   ;;  %s514_s5 = smov [#allocation15]  }
  0x25   :  { %v166_v2 = vand.u32 2147483647, %v544_v0  ;;  %v167_v3 = vand.u32 2147483647, %v546_v1  ;;  %v550_v4 = vld [vmem:[#allocation9] sm:$0xff]  ;;  %v552_v5 = vld [vmem:[#allocation9 + $0x8] sm:$0xff] }
  0x26   :  { %v116_v8 = vand.u32 2147483647, %v550_v4  ;;  %v117_v9 = vand.u32 2147483647, %v552_v5  ;;  %v95_v23 = vshrl.u32 %v94_v16, 7  ;;  %v565_v26 = vld [vmem:[#allocation14] sm:$0xff] }
  0x27   :  { %v168_v6 = vsub.f32 0.0, %v166_v2  ;;  %v169_v7 = vsub.f32 0.0, %v167_v3  ;;  %v567_v27 = vld [vmem:[#allocation14 + $0x8] sm:$0xff]  ;;  %vm208_vm0 = vcmp.ge.f32.partialorder %v544_v0, 0.0  ;;  %v112_v29 = vmul.f32 0.5, %v565_v26  ;;  %377 = sst [smem:[#allocation15 + $0x7]] %s513_s0 }
  0x28   :  { %v118_v12 = vsub.f32 0.0, %v116_v8  ;;  %v119_v13 = vsub.f32 0.0, %v117_v9  ;;  %v103_v28 = vand.u32 3, %v95_v23  ;;  %vm209_vm1 = vcmp.ge.f32.partialorder %v546_v1, 0.0 }
  0x29   :  { %v170_v10 = vmul.f32 1.442695, %v168_v6  ;;  %v172_v11 = vmul.f32 1.442695, %v169_v7  ;;  %v113_v30 = vmul.f32 0.5, %v567_v27  ;;  %v148_v32 = vsub.f32 1.0, %v565_v26 }
  0x2a   :  { %v120_v14 = vmul.f32 1.442695, %v118_v12  ;;  %v122_v15 = vmul.f32 1.442695, %v119_v13  ;;  %vm574_vm2 = vcmp.eq.s32.totalorder %v103_v28, 0  ;;  %v124_v34 = vsub.f32 0.0, %v550_v4 }
  0x2b   :  { %412 = vpow2.f32 %v170_v10  ;;  %v125_v35 = vsub.f32 0.0, %v552_v5  ;;  %v149_v38 = vsub.f32 1.0, %v567_v27  ;;  %v174_v39 = vsub.f32 0.0, %v544_v0 }
  0x2c   :  { %414 = vpow2.f32 %v172_v11  ;;  %vm160_vm3 = vcmp.ge.f32.partialorder %v550_v4, 0.0  ;;  %vm161_vm4 = vcmp.ge.f32.partialorder %v552_v5, 0.0  ;;  %v586_v40 = vadd.f32 1.0, %v112_v29 }
  0x2d   :  { %416 = vpow2.f32 %v120_v14  ;;  %v175_v41 = vsub.f32 0.0, %v546_v1  ;;  %v589_v42 = vadd.f32 1.0, %v113_v30  ;;  %v126_v46 = vmax.f32 %v124_v34, 0.0 }
  0x2e   :  { %418 = vpow2.f32 %v122_v15  ;;  %v595_v47 = vmul.f32 %v148_v32, %v550_v4  ;;  %v127_v51 = vmax.f32 %v125_v35, 0.0  ;;  %v601_v53 = vmul.f32 %v149_v38, %v552_v5 }
  0x2f   :  { %v603_v54 = vmax.f32 %v174_v39, 0.0  ;;  %v177_v57 = vmax.f32 %v175_v41, 0.0 }
  0x38   :  { %v556_v17 = vpop.eup %412 }
  0x39   :  { %v558_v18 = vpop.eup %414  ;;  %v178_v19 = vadd.f32 1.0, %v556_v17  ;;  %v181_v36 = vmul.f32 -0.5, %v556_v17  ;;  %v184_v58 = vand.u32 2147483647, %v556_v17 }
  0x3a   :  { %v417_v20 = vpop.eup %416  ;;  %v187_v21 = vadd.f32 1.0, %v558_v18  ;;  %v190_v49 = vmul.f32 -0.5, %v558_v18  ;;  %v193_v59 = vand.u32 2147483647, %v558_v18 }
  0x3b   :  { %v562_v22 = vpop.eup %418  ;;  %420 = vrcp.f32 %v178_v19  ;;  %v128_v24 = vadd.f32 1.0, %v417_v20  ;;  %v131_v31 = vmul.f32 -0.5, %v417_v20  ;;  %v134_v44 = vand.u32 2147483647, %v417_v20 }
  0x3c   :  { %422 = vrcp.f32 %v187_v21  ;;  %v137_v25 = vadd.f32 1.0, %v562_v22  ;;  %v140_v37 = vmul.f32 -0.5, %v562_v22  ;;  %v143_v45 = vand.u32 2147483647, %v562_v22 }
  0x3d   :  { %424 = vrcp.f32 %v128_v24  ;;  %v132_v43 = vadd.f32 1.0, %v131_v31  ;;  %v182_v48 = vadd.f32 1.0, %v181_v36  ;;  %vm609_vm5 = vcmp.lt.f32.partialorder %v134_v44, 0.0004427343 }
  0x3e   :  { %426 = vrcp.f32 %v137_v25  ;;  %v141_v52 = vadd.f32 1.0, %v140_v37  ;;  %vm613_vm6 = vcmp.lt.f32.partialorder %v143_v45, 0.0004427343  ;;  %v191_v9 = vadd.f32 1.0, %v190_v49 }
  0x3f   :  { %428 = vlog2.f32 %v128_v24  ;;  %v133_v62 = vmul.f32 %v417_v20, %v132_v43  ;;  %v183_v8 = vmul.f32 %v556_v17, %v182_v48  ;;  %vm185_vm7 = vcmp.lt.f32.partialorder %v184_v58, 0.0004427343 }
  0x40   :  { %430 = vlog2.f32 %v137_v25  ;;  %v142_v14 = vmul.f32 %v562_v22, %v141_v52  ;;  %v192_v48 = vmul.f32 %v558_v18, %v191_v9  ;;  %vm194_vm8 = vcmp.lt.f32.partialorder %v193_v59, 0.0004427343 }
  0x41   :  { %432 = vlog2.f32 %v178_v19  ;;  %v198_v59 = vmul.f32 %v148_v32, %v544_v0 }
  0x42   :  { %434 = vlog2.f32 %v187_v21 }
  0x48   :  { %v421_v50 = vpop.eup %420 }
  0x49   :  { %v423_v55 = vpop.eup %422  ;;  %v210_v56 = vmul.f32 %v421_v50, %v556_v17 }
  0x4a   :  { %v425_v60 = vpop.eup %424  ;;  %v211_v61 = vmul.f32 %v423_v55, %v558_v18 }
  0x4b   :  { %v427_v3 = vpop.eup %426  ;;  %v212_v6 = vsel %vm208_vm0, %v421_v50, %v210_v56  ;;  %v162_v7 = vmul.f32 %v425_v60, %v417_v20 }
  0x4c   :  { %v429_v10 = vpop.eup %428  ;;  %v213_v11 = vsel %vm209_vm1, %v423_v55, %v211_v61  ;;  %v248_v12 = vmul.f32 %v212_v6, %v565_v26  ;;  %v163_v13 = vmul.f32 %v427_v3, %v562_v22  ;;  %v258_v21 = vmul.f32 %v212_v6, %v212_v6 }
  0x4d   :  { %v431_v15 = vpop.eup %430  ;;  %v249_v16 = vmul.f32 %v213_v11, %v567_v27  ;;  %v164_v19 = vsel %vm160_vm3, %v425_v60, %v162_v7  ;;  %v130_v20 = vmul.f32 0.6931472, %v429_v10  ;;  %v259_v5 = vmul.f32 %v213_v11, %v213_v11 }
  0x4e   :  { %v250_v17 = vsel %vm574_vm2, %v248_v12, 0.0  ;;  %v165_v23 = vsel %vm161_vm4, %v427_v3, %v163_v13  ;;  %v228_v24 = vmul.f32 %v164_v19, %v565_v26  ;;  %v238_v25 = vmul.f32 %v164_v19, %v164_v19  ;;  %v433_v30 = vpop.eup %432 }
  0x4f   :  { %v251_v22 = vsel %vm574_vm2, %v249_v16, 0.0  ;;  %v229_v28 = vmul.f32 %v165_v23, %v567_v27  ;;  %v239_v29 = vmul.f32 %v165_v23, %v165_v23  ;;  %v136_v4 = vsel %vm609_vm5, %v133_v62, %v130_v20  ;;  %v435_v36 = vpop.eup %434 }
  0x50   :  { %v336_v31 = vadd.f32 %v251_v22, %v250_v17  ;;  %v230_v34 = vsel %vm574_vm2, %v228_v24, 0.0  ;;  %v139_v35 = vmul.f32 0.6931472, %v431_v15  ;;  %v240_v39 = vsel %vm574_vm2, %v238_v25, 0.0 }
  0x51   :  { %v231_v37 = vsel %vm574_vm2, %v229_v28, 0.0  ;;  %v241_v41 = vsel %vm574_vm2, %v239_v29, 0.0  ;;  %v146_v43 = vadd.f32 %v136_v4, %v126_v46  ;;  %v180_v52 = vmul.f32 0.6931472, %v433_v30 }
  0x52   :  { %337 = vadd.xlane.f32.xlu0 %v336_v31  ;;  %v308_v44 = vadd.f32 %v231_v37, %v230_v34  ;;  %v145_v45 = vsel %vm613_vm6, %v142_v14, %v139_v35  ;;  %v322_v55 = vadd.f32 %v241_v41, %v240_v39  ;;  %v260_v56 = vsel %vm574_vm2, %v258_v21, 0.0 }
  0x53   :  { %v147_v49 = vadd.f32 %v145_v45, %v127_v51  ;;  %v152_v50 = vmul.f32 %v146_v43, %v586_v40  ;;  %v189_v60 = vmul.f32 0.6931472, %v435_v36  ;;  %v261_v58 = vsel %vm574_vm2, %v259_v5, 0.0 }
  0x54   :  { %309 = vadd.xlane.f32.xlu1 %v308_v44  ;;  %v186_v62 = vsel %vm185_vm7, %v183_v8, %v180_v52  ;;  %v199_v3 = vmul.f32 %v149_v38, %v546_v1  ;;  %v268_v7 = vmul.f32 %v565_v26, %v565_v26 }
  0x55   :  { %v153_v46 = vmul.f32 %v147_v49, %v589_v42  ;;  %v154_v61 = vadd.f32 %v152_v50, %v595_v47  ;;  %v195_v18 = vsel %vm194_vm8, %v192_v48, %v189_v60  ;;  %v196_v51 = vadd.f32 %v186_v62, %v603_v54 }
  0x56   :  { %v197_v2 = vadd.f32 %v195_v18, %v177_v57  ;;  %v350_v47 = vadd.f32 %v261_v58, %v260_v56  ;;  %v269_v54 = vmul.f32 %v567_v27, %v567_v27  ;;  %v270_v1 = vsel %vm574_vm2, %v268_v7, 0.0 }
  0x57   :  { %v155_v63 = vadd.f32 %v153_v46, %v601_v53  ;;  %v200_v6 = vmul.f32 %v196_v51, %v586_v40 }
  0x58   :  { %323 = vadd.xlane.f32.xlu1 %v322_v55  ;;  %v201_v0 = vmul.f32 %v197_v2, %v589_v42  ;;  %v271_v38 = vsel %vm574_vm2, %v269_v54, 0.0 }
  0x59   :  { %v280_v8 = vadd.f32 %v155_v63, %v154_v61  ;;  %v202_v32 = vadd.f32 %v200_v6, %v198_v59  ;;  %v364_v57 = vadd.f32 %v271_v38, %v270_v1 }
  0x5a   :  { %v203_v53 = vadd.f32 %v201_v0, %v199_v3 }
  0x5b   :  { %281 = vadd.xlane.f32.xlu0 %v280_v8 }
  0x5c   :  { %351 = vadd.xlane.f32.xlu1 %v350_v47  ;;  %v294_v40 = vadd.f32 %v203_v53, %v202_v32 }
  0x5f   :  { %295 = vadd.xlane.f32.xlu0 %v294_v40 }
  0x63   :  { %365 = vadd.xlane.f32.xlu0 %v364_v57 }
  0xdb   :  { %v338_v27 = vpop.xlane.xlu0 %337 }
  0xdc   :  { %v339_v10 = vrot.slane %v338_v27, 4 }
  0xdd   :  { %v310_v26 = vpop.xlane.xlu1 %309 }
  0xde   :  { %v311_v9 = vrot.slane %v310_v26, 4  ;;  %v340_v19 = vadd.f32 %v339_v10, %v338_v27 }
  0xe0   :  { %v312_v12 = vadd.f32 %v311_v9, %v310_v26  ;;  %v341_v28 = vrot.slane %v340_v19, 2 }
  0xe1   :  { %v324_v42 = vpop.xlane.xlu1 %323 }
  0xe2   :  { %v325_v11 = vrot.slane %v324_v42, 4  ;;  %v313_v21 = vrot.slane %v312_v12, 2  ;;  %v342_v41 = vadd.f32 %v341_v28, %v340_v19 }
  0xe4   :  { %v326_v13 = vadd.f32 %v325_v11, %v324_v42  ;;  %v282_v14 = vpop.xlane.xlu0 %281  ;;  %v314_v34 = vadd.f32 %v313_v21, %v312_v12  ;;  %v343_v56 = vrot.slane %v342_v41, 1 }
  0xe5   :  { %v283_v15 = vrot.slane %v282_v14, 4  ;;  %v352_v16 = vpop.xlane.xlu1 %351 }
  0xe6   :  { %v353_v33 = vrot.slane %v352_v16, 4  ;;  %v327_v17 = vrot.slane %v326_v13, 2  ;;  %v315_v48 = vrot.slane %v314_v34, 1  ;;  %v344_v51 = vadd.f32 %v343_v56, %v342_v41 }
  0xe7   :  { %v284_v20 = vadd.f32 %v283_v15, %v282_v14 }
  0xe8   :  { %v354_v23 = vadd.f32 %v353_v33, %v352_v16  ;;  %v296_v24 = vpop.xlane.xlu0 %295  ;;  %v328_v35 = vadd.f32 %v327_v17, %v326_v13  ;;  %v316_v61 = vadd.f32 %v315_v48, %v314_v34 }
  0xe9   :  { %v285_v25 = vrot.slane %v284_v20, 2  ;;  %v297_v22 = vrot.slane %v296_v24, 4 }
  0xea   :  { %v355_v29 = vrot.slane %v354_v23, 2  ;;  %v329_v52 = vrot.slane %v328_v35, 1 }
  0xeb   :  { %v298_v4 = vadd.f32 %v297_v22, %v296_v24  ;;  %v286_v30 = vadd.f32 %v285_v25, %v284_v20 }
  0xec   :  { %v366_v31 = vpop.xlane.xlu0 %365  ;;  %v356_v5 = vadd.f32 %v355_v29, %v354_v23  ;;  %v330_v58 = vadd.f32 %v329_v52, %v328_v35 }
  0xed   :  { %v299_v36 = vrot.slane %v298_v4, 2  ;;  %v367_v37 = vrot.slane %v366_v31, 4  ;;  %v287_v39 = vrot.slane %v286_v30, 1 }
  0xee   :  { %v357_v55 = vrot.slane %v356_v5, 1 }
  0xef   :  { %v368_v43 = vadd.f32 %v367_v37, %v366_v31  ;;  %v288_v44 = vadd.f32 %v287_v39, %v286_v30  ;;  %v300_v45 = vadd.f32 %v299_v36, %v298_v4 }
  0xf0   :  { %v358_v62 = vadd.f32 %v357_v55, %v356_v5 }
  0xf1   :  { %v369_v49 = vrot.slane %v368_v43, 2  ;;  %393 = vpush %v288_v44  ;;  %v301_v50 = vrot.slane %v300_v45, 1 }
  0xf3   :  { %v370_v60 = vadd.f32 %v369_v49, %v368_v43  ;;  %v302_v46 = vadd.f32 %v301_v50, %v300_v45 }
  0xf5   :  { %395 = vpush %v302_v46  ;;  %v371_v18 = vrot.slane %v370_v60, 1 }
  0xf6   :  { %397 = vpush %v316_v61 }
  0xf7   :  { %399 = vpush %v330_v58  ;;  %v372_v59 = vadd.f32 %v371_v18, %v370_v60 }
  0xf8   :  { %401 = vpush %v344_v51 }
  0xf9   :  { %403 = vpush %v358_v62 }
  0xfa   :  { %405 = vpush %v372_v59 }
 0x122   :  { %s394_s2 = spop %393 }
 0x123   :  { %291 = sst [smem:[#allocation15]] %s394_s2 }
 0x126   :  { %s396_s26 = spop %395 }
 0x127   :  { %305 = sst [smem:[#allocation15 + $0x1]] %s396_s26  ;;  %s398_s27 = spop %397 }
 0x128   :  { %319 = sst [smem:[#allocation15 + $0x2]] %s398_s27  ;;  %s400_s28 = spop %399 }
 0x129   :  { %333 = sst [smem:[#allocation15 + $0x3]] %s400_s28  ;;  %s402_s29 = spop %401 }
 0x12a   :  { %347 = sst [smem:[#allocation15 + $0x4]] %s402_s29  ;;  %s404_s30 = spop %403 }
 0x12b   :  { %361 = sst [smem:[#allocation15 + $0x5]] %s404_s30  ;;  %s406_s4 = spop %405 }
 0x12c   :  { %375 = sst [smem:[#allocation15 + $0x6]] %s406_s4 }
 0x12d   :  { %385 = dma.smem_to_hbm %s514_s5, 16, %s680_s3, [#allocation11]  }
 0x12e   :  { %508 = dma.done.wait [#allocation11], 16  }
 0x12f   :  { %509 = vsyncadd [#allocation11], 4294967280 }
 0x130   :  { %389 = sfence }
 0x131   :  { %390 = vsyncpa [#allocation10], 1 }
 0x132   :  { %391 = vsyncpa [#allocation13], 1 }
 0x133   :  { %392 = vsyncpa [#allocation11], 1 }

</bundles_post_ra>
